<compile_context>
chip_gen: v7x
topology: tpu7x:2x2x1
jax: 0.10.0
libtpu: 0.0.40
codegen_flags: <defaults>
</compile_context>

<pallas_src>
import functools

import jax
import jax.numpy as jnp
from jax.experimental import pallas as pl
from jax.experimental.pallas import tpu as pltpu


_LANES = 128
# (4096, 128) f32 block = 2 MiB; 2 inputs x 2 pipeline buffers = 8 MiB.
_MAX_TILE_ROWS = 4096


def _sublane_multiple(dtype) -> int:
    """Minimum row-tile multiple for a streamed dtype (8/16/32 for 4/2/1 B)."""
    return {4: 8, 2: 16, 1: 32}[jnp.dtype(dtype).itemsize]


def _stream_dtype(a: jax.Array) -> jax.Array:
    """Pick the cheapest HBM-streaming dtype; the kernel upcasts to f32."""
    dt = jnp.dtype(a.dtype)
    if dt == jnp.bool_:
        return a.astype(jnp.int8)         # 1 byte/elem instead of 4
    if dt.itemsize > 4:                   # f64 / i64 (x64 mode): not tiled well
        return a.astype(jnp.float32)
    return a                              # f32 / bf16 / f16 / i32 / i16 / i8


def _num_tensorcores() -> int:
    """Conservative per-chip TensorCore count (2 only when clearly reported)."""
    try:
        info = pltpu.get_tpu_info()
        for attr in ("num_cores", "core_count", "num_cores_per_chip",
                     "cores_per_chip", "num_tensorcores"):
            v = getattr(info, attr, None)
            if isinstance(v, int) and v == 2:
                return 2
    except Exception:
        pass
    try:
        v = getattr(jax.devices()[0], "num_cores", None)
        if isinstance(v, int) and v == 2:
            return 2
    except Exception:
        pass
    return 1


def _dice_kernel(nrows_ref, x_ref, t_ref, tp_out_ref, s_out_ref,
                 tp_acc, s_acc, *, two_d_grid, apply_mask):
    if two_d_grid:
        shard = pl.program_id(0)
        i = pl.program_id(1)
        n_i = pl.num_programs(1)
        tile_idx = shard * n_i + i
    else:
        i = pl.program_id(0)
        n_i = pl.num_programs(0)
        tile_idx = i

    @pl.when(i == 0)
    def _init():
        tp_acc[...] = jnp.zeros_like(tp_acc)
        s_acc[...] = jnp.zeros_like(s_acc)

    tile_rows = x_ref.shape[0]
    r = tile_rows // 8

    def _accumulate(mask_rows):
        x = x_ref[...].astype(jnp.float32)
        t = t_ref[...].astype(jnp.float32)
        prod = x * t
        ssum = x + t
        if mask_rows:
            # Only the ragged last tile pays for the mask; garbage rows past
            # the true row count are zeroed (where() discards NaN/Inf safely).
            local_row = jax.lax.broadcasted_iota(jnp.int32, (tile_rows, 1), 0)
            valid = (tile_idx * tile_rows + local_row) < nrows_ref[0]
            prod = jnp.where(valid, prod, 0.0)
            ssum = jnp.where(valid, ssum, 0.0)
        # Fold the tile into a vreg-sized (8, 128) slab with pure cross-vreg
        # VPU adds; the cross-lane reduction happens once, in the wrapper.
        tp_acc[...] += jnp.sum(prod.reshape(r, 8, _LANES), axis=0)
        s_acc[...] += jnp.sum(ssum.reshape(r, 8, _LANES), axis=0)

    if apply_mask:
        base_row = tile_idx * tile_rows
        nrows = nrows_ref[0]
        is_full = base_row + tile_rows <= nrows
        is_ragged = jnp.logical_and(base_row < nrows, jnp.logical_not(is_full))

        @pl.when(is_full)          # full tiles: unmasked fast path
        def _full():
            _accumulate(mask_rows=False)

        @pl.when(is_ragged)        # ragged last tile: masked
        def _ragged():
            _accumulate(mask_rows=True)
        # Fully out-of-range (clamped duplicate) tiles skip accumulation.
    else:
        _accumulate(mask_rows=False)

    @pl.when(i == n_i - 1)
    def _finalize():
        tp_out_ref[...] = tp_acc[...]
        s_out_ref[...] = s_acc[...]


def dice_loss(inputs: jax.Array, target: jax.Array) -> jax.Array:
    """Pallas TPU implementation of DiceLoss.forward(inputs, target)."""
    assert inputs.shape == target.shape, "inputs/target must match shapes"
    smooth = jnp.float32(1e-05)

    x = _stream_dtype(inputs.reshape(-1))
    t = _stream_dtype(target.reshape(-1))

    n = x.shape[0]
    if n == 0:
        # tp = fp = fn = 0 -> dice = smooth / smooth = 1 -> loss = 0.
        return jnp.float32(0.0)

    # Lane-dense (rows, 128) views; only a <128-element flat pad when needed
    # (zeros contribute nothing to either sum).
    rows = pl.cdiv(n, _LANES)
    n_lanes = rows * _LANES
    if n_lanes != n:
        x = jnp.pad(x, (0, n_lanes - n))
        t = jnp.pad(t, (0, n_lanes - n))
    x2 = x.reshape(rows, _LANES)
    t2 = t.reshape(rows, _LANES)

    # Row-tile size: multiple of both operands' sublane tiling (8/16/32).
    m = max(_sublane_multiple(x2.dtype), _sublane_multiple(t2.dtype))
    tile_rows = min(_MAX_TILE_ROWS, (rows // m) * m)
    if tile_rows == 0:
        # Tiny input (< m rows): zero-pad rows once (zeros are sum-neutral).
        x2 = jnp.pad(x2, ((0, m - rows), (0, 0)))
        t2 = jnp.pad(t2, ((0, m - rows), (0, 0)))
        rows = m
        tile_rows = m
    tiles = pl.cdiv(rows, tile_rows)

    # Split across TensorCores only when the chip actually has two (v7x).
    n_splits = 2 if (_num_tensorcores() == 2 and tiles >= 2) else 1

    nrows = jnp.array([rows], dtype=jnp.int32)

    if n_splits == 1:
        grid = (tiles,)
        apply_mask = (rows % tile_rows) != 0
        in_map = lambda i, nrows_ref: (i, 0)
        out_map = lambda i, nrows_ref: (0, 0)
        dims = (pltpu.ARBITRARY,)
    else:
        tiles_per_split = pl.cdiv(tiles, n_splits)
        last_tile = tiles - 1
        grid = (n_splits, tiles_per_split)
        apply_mask = ((rows % tile_rows) != 0) or (n_splits * tiles_per_split != tiles)
        in_map = lambda s, i, nrows_ref: (
            jnp.minimum(s * tiles_per_split + i, last_tile), 0)
        out_map = lambda s, i, nrows_ref: (s, 0)
        # Force a real one-shard-per-TensorCore split on 2-TC chips.
        dims = (pltpu.CORE_PARALLEL, pltpu.ARBITRARY)

    out_tp, out_s = pl.pallas_call(
        functools.partial(_dice_kernel,
                          two_d_grid=(n_splits == 2),
                          apply_mask=apply_mask),
        out_shape=(
            jax.ShapeDtypeStruct((n_splits * 8, _LANES), jnp.float32),
            jax.ShapeDtypeStruct((n_splits * 8, _LANES), jnp.float32),
        ),
        grid_spec=pltpu.PrefetchScalarGridSpec(
            num_scalar_prefetch=1,
            grid=grid,
            in_specs=[
                pl.BlockSpec((tile_rows, _LANES), in_map),
                pl.BlockSpec((tile_rows, _LANES), in_map),
            ],
            out_specs=[
                pl.BlockSpec((8, _LANES), out_map),
                pl.BlockSpec((8, _LANES), out_map),
            ],
            scratch_shapes=[
                pltpu.VMEM((8, _LANES), jnp.float32),
                pltpu.VMEM((8, _LANES), jnp.float32),
            ],
        ),
        compiler_params=pltpu.CompilerParams(
            dimension_semantics=dims,
            vmem_limit_bytes=32 * 1024 * 1024,
        ),
    )(nrows, x2, t2)

    tp = jnp.sum(out_tp)
    s = jnp.sum(out_s)                  # s = sum(x) + sum(t) = 2*tp + fp + fn
    dice = (2.0 * tp + smooth) / (s + smooth)
    return (1.0 - dice).astype(jnp.float32)


def _dice_loss_ref(inputs, target):
    smooth = 1e-05
    inputs = inputs.astype(jnp.float32)
    target = target.astype(jnp.float32)
    tp = jnp.sum(inputs * target)
    fp = jnp.sum(inputs) - tp
    fn = jnp.sum(target) - tp
    dice = (2 * tp + smooth) / (2 * tp + fp + fn + smooth)
    return 1 - dice


if __name__ == "__main__":
    key = jax.random.PRNGKey(0)
    k1, k2, k3, k4, k5, k6, k7, k8 = jax.random.split(key, 8)

    # 1) Small NCHW case (typical module use): single tile, no masking.
    inputs1 = jax.nn.sigmoid(jax.random.normal(k1, (2, 4, 16, 16), jnp.float32))
    target1 = (jax.random.uniform(k2, (2, 4, 16, 16)) > 0.5).astype(jnp.float32)
    loss1 = jax.block_until_ready(dice_loss(inputs1, target1))
    ref1 = jax.block_until_ready(_dice_loss_ref(inputs1, target1))
    assert jnp.allclose(loss1, ref1, rtol=1e-5, atol=1e-6), (loss1, ref1)

    # 2) Larger case: multiple tiles + ragged last tile (masked slow path).
    inputs2 = jax.nn.sigmoid(jax.random.normal(k3, (8, 8, 100, 100), jnp.float32))
    target2 = (jax.random.uniform(k4, (8, 8, 100, 100)) > 0.5).astype(jnp.float32)
    loss2 = jax.block_until_ready(dice_loss(inputs2, target2))
    ref2 = jax.block_until_ready(_dice_loss_ref(inputs2, target2))
    assert jnp.allclose(loss2, ref2, rtol=1e-4, atol=1e-5), (loss2, ref2)

    # 3) Boolean target streamed as int8 (narrow HBM traffic path).
    inputs3 = jax.nn.sigmoid(jax.random.normal(k5, (2, 4, 32, 32), jnp.float32))
    target3 = jax.random.uniform(k6, (2, 4, 32, 32)) > 0.5          # bool
    loss3 = jax.block_until_ready(dice_loss(inputs3, target3))
    ref3 = jax.block_until_ready(_dice_loss_ref(inputs3, target3))
    assert jnp.allclose(loss3, ref3, rtol=1e-5, atol=1e-6), (loss3, ref3)

    # 4) Odd element count: exercises the flat lane pad + tiny ragged tiles.
    inputs4 = jax.nn.sigmoid(jax.random.normal(k7, (3, 5, 7, 11), jnp.float32))
    target4 = (jax.random.uniform(k8, (3, 5, 7, 11)) > 0.5).astype(jnp.float32)
    loss4 = jax.block_until_ready(dice_loss(inputs4, target4))
    ref4 = jax.block_until_ready(_dice_loss_ref(inputs4, target4))
    assert jnp.allclose(loss4, ref4, rtol=1e-5, atol=1e-6), (loss4, ref4)

    print("KERNEL_OK")
</pallas_src>

<mosaic_0001>
module attributes {stable_mosaic.version = 11 : i64} {
  func.func @_dice_kernel(%arg0: i32, %arg1: memref<1xi32, #tpu.memory_space<smem>>, %arg2: memref<16x128xf32, #tpu.memory_space<vmem>>, %arg3: memref<16x128xf32, #tpu.memory_space<vmem>>, %arg4: memref<8x128xf32, #tpu.memory_space<vmem>>, %arg5: memref<8x128xf32, #tpu.memory_space<vmem>>, %arg6: memref<8x128xf32, #tpu.memory_space<vmem>>, %arg7: memref<8x128xf32, #tpu.memory_space<vmem>>) attributes {dimension_semantics = [#tpu.dimension_semantics<arbitrary>], iteration_bounds = array<i64: 1>, scalar_prefetch = 1 : i64, scratch_operands = 2 : i64, tpu.core_type = #tpu.core_type<tc>, window_params = [{transform_indices = @transform_0, window_bounds = array<i64: 16, 128>}, {transform_indices = @transform_1, window_bounds = array<i64: 16, 128>}, {pipeline_mode = #tpu.pipeline_mode<synchronous>, transform_indices = @transform_2, window_bounds = array<i64: 8, 128>}, {pipeline_mode = #tpu.pipeline_mode<synchronous>, transform_indices = @transform_3, window_bounds = array<i64: 8, 128>}]} {
    %c0_i32 = arith.constant 0 : i32
    %0 = arith.cmpi eq, %arg0, %c0_i32 : i32
    %1 = arith.extui %0 : i1 to i32
    %c0_i32_0 = arith.constant 0 : i32
    %2 = arith.cmpi ne, %1, %c0_i32_0 : i32
    scf.if %2 {
      %cst_15 = arith.constant 0.000000e+00 : f32
      %20 = vector.broadcast %cst_15 : f32 to vector<8x128xf32>
      %c0_16 = arith.constant 0 : index
      %c0_17 = arith.constant 0 : index
      %21 = vector.load %arg6[%c0_16, %c0_17] : memref<8x128xf32, #tpu.memory_space<vmem>>, vector<8x128xf32>
      tpu.vector_store %arg6[%c0_16, %c0_17], %20 {strides = array<i32>} : memref<8x128xf32, #tpu.memory_space<vmem>>, vector<8x128xf32>,
      %cst_18 = arith.constant 0.000000e+00 : f32
      %22 = vector.broadcast %cst_18 : f32 to vector<8x128xf32>
      %c0_19 = arith.constant 0 : index
      %c0_20 = arith.constant 0 : index
      %23 = vector.load %arg7[%c0_19, %c0_20] : memref<8x128xf32, #tpu.memory_space<vmem>>, vector<8x128xf32>
      tpu.vector_store %arg7[%c0_19, %c0_20], %22 {strides = array<i32>} : memref<8x128xf32, #tpu.memory_space<vmem>>, vector<8x128xf32>,
    } else {
    }
    %c0 = arith.constant 0 : index
    %c0_1 = arith.constant 0 : index
    %3 = vector.load %arg2[%c0, %c0_1] : memref<16x128xf32, #tpu.memory_space<vmem>>, vector<16x128xf32>
    %c0_2 = arith.constant 0 : index
    %c0_3 = arith.constant 0 : index
    %4 = vector.load %arg3[%c0_2, %c0_3] : memref<16x128xf32, #tpu.memory_space<vmem>>, vector<16x128xf32>
    %5 = arith.mulf %3, %4 : vector<16x128xf32>
    %6 = arith.addf %3, %4 : vector<16x128xf32>
    %c0_4 = arith.constant 0 : index
    %c0_5 = arith.constant 0 : index
    %7 = vector.load %arg6[%c0_4, %c0_5] : memref<8x128xf32, #tpu.memory_space<vmem>>, vector<8x128xf32>
    %8 = vector.shape_cast %5 : vector<16x128xf32> to vector<2x8x128xf32>
    %cst = arith.constant dense<0.000000e+00> : vector<8x128xf32>
    %9 = vector.multi_reduction <add>, %8, %cst [0] : vector<2x8x128xf32> to vector<8x128xf32>
    %10 = arith.addf %7, %9 : vector<8x128xf32>
    %c0_6 = arith.constant 0 : index
    %c0_7 = arith.constant 0 : index
    %11 = vector.load %arg6[%c0_6, %c0_7] : memref<8x128xf32, #tpu.memory_space<vmem>>, vector<8x128xf32>
    tpu.vector_store %arg6[%c0_6, %c0_7], %10 {strides = array<i32>} : memref<8x128xf32, #tpu.memory_space<vmem>>, vector<8x128xf32>,
    %c0_8 = arith.constant 0 : index
    %c0_9 = arith.constant 0 : index
    %12 = vector.load %arg7[%c0_8, %c0_9] : memref<8x128xf32, #tpu.memory_space<vmem>>, vector<8x128xf32>
    %13 = vector.shape_cast %6 : vector<16x128xf32> to vector<2x8x128xf32>
    %cst_10 = arith.constant dense<0.000000e+00> : vector<8x128xf32>
    %14 = vector.multi_reduction <add>, %13, %cst_10 [0] : vector<2x8x128xf32> to vector<8x128xf32>
    %15 = arith.addf %12, %14 : vector<8x128xf32>
    %c0_11 = arith.constant 0 : index
    %c0_12 = arith.constant 0 : index
    %16 = vector.load %arg7[%c0_11, %c0_12] : memref<8x128xf32, #tpu.memory_space<vmem>>, vector<8x128xf32>
    tpu.vector_store %arg7[%c0_11, %c0_12], %15 {strides = array<i32>} : memref<8x128xf32, #tpu.memory_space<vmem>>, vector<8x128xf32>,
    %c0_i32_13 = arith.constant 0 : i32
    %17 = arith.cmpi eq, %arg0, %c0_i32_13 : i32
    %18 = arith.extui %17 : i1 to i32
    %c0_i32_14 = arith.constant 0 : i32
    %19 = arith.cmpi ne, %18, %c0_i32_14 : i32
    scf.if %19 {
      %c0_15 = arith.constant 0 : index
      %c0_16 = arith.constant 0 : index
      %20 = vector.load %arg6[%c0_15, %c0_16] : memref<8x128xf32, #tpu.memory_space<vmem>>, vector<8x128xf32>
      %c0_17 = arith.constant 0 : index
      %c0_18 = arith.constant 0 : index
      %21 = vector.load %arg4[%c0_17, %c0_18] : memref<8x128xf32, #tpu.memory_space<vmem>>, vector<8x128xf32>
      tpu.vector_store %arg4[%c0_17, %c0_18], %20 {strides = array<i32>} : memref<8x128xf32, #tpu.memory_space<vmem>>, vector<8x128xf32>,
      %c0_19 = arith.constant 0 : index
      %c0_20 = arith.constant 0 : index
      %22 = vector.load %arg7[%c0_19, %c0_20] : memref<8x128xf32, #tpu.memory_space<vmem>>, vector<8x128xf32>
      %c0_21 = arith.constant 0 : index
      %c0_22 = arith.constant 0 : index
      %23 = vector.load %arg5[%c0_21, %c0_22] : memref<8x128xf32, #tpu.memory_space<vmem>>, vector<8x128xf32>
      tpu.vector_store %arg5[%c0_21, %c0_22], %22 {strides = array<i32>} : memref<8x128xf32, #tpu.memory_space<vmem>>, vector<8x128xf32>,
    } else {
    }
    return
  }
  func.func @transform_0(%arg0: i32, %arg1: memref<1xi32, #tpu.memory_space<smem>>) -> (i32, i32) {
    %c0_i32 = arith.constant 0 : i32
    %c0_i32_0 = arith.constant 0 : i32
    return %arg0, %c0_i32 : i32, i32
  }
  func.func @transform_1(%arg0: i32, %arg1: memref<1xi32, #tpu.memory_space<smem>>) -> (i32, i32) {
    %c0_i32 = arith.constant 0 : i32
    %c0_i32_0 = arith.constant 0 : i32
    return %arg0, %c0_i32 : i32, i32
  }
  func.func @transform_2(%arg0: i32, %arg1: memref<1xi32, #tpu.memory_space<smem>>) -> (i32, i32) {
    %c0_i32 = arith.constant 0 : i32
    %c0_i32_0 = arith.constant 0 : i32
    %c0_i32_1 = arith.constant 0 : i32
    return %c0_i32, %c0_i32_0 : i32, i32
  }
  func.func @transform_3(%arg0: i32, %arg1: memref<1xi32, #tpu.memory_space<smem>>) -> (i32, i32) {
    %c0_i32 = arith.constant 0 : i32
    %c0_i32_0 = arith.constant 0 : i32
    %c0_i32_1 = arith.constant 0 : i32
    return %c0_i32, %c0_i32_0 : i32, i32
  }
}

</mosaic_0001>

<bundles_post_ra>
// kernel: tpu_custom_call.1
= control target key start
LH: loop header
LB: loop body
LE: loop exit
PB: predicated region body
PF: predicated region fallthrough
CT: control target
= control target key end

     0   :  { %11 = vsyncpa [#allocation7], 0  ;;  %s285_s0 = inlined_call_operand.<no memory space> [shape: s32[1], index: 0, kind: input, shape index: {}]   ;;  %s286_s1 = inlined_call_operand.hbm [shape: f32[16,128], index: 1, kind: input, shape index: {}]   ;;  %s287_s2 = inlined_call_operand.hbm [shape: f32[16,128], index: 2, kind: input, shape index: {}]   ;;  %s288_s3 = inlined_call_operand.hbm [shape: f32[8,128], index: 3, kind: output, shape index: {0}]   ;;  %s289_s4 = inlined_call_operand.hbm [shape: f32[8,128], index: 4, kind: output, shape index: {1}]  }
   0x1   :  { %12 = vsyncpa [#allocation10], 0 }
   0x2   :  { %13 = vsyncpa [#allocation8], 0 }
   0x3   :  { %14 = vsyncpa [#allocation13], 0  ;;  %s206_s15 = smov [#allocation6]   ;;  %s110_s18 = scalar_lea.hbm %s286_s1, 256 }
   0x4   :  { %s20_s16 = sshll.u32 %s206_s15, 4  ;;  %p111_p0 = scmp.ne.s32.totalorder %s286_s1, %s110_s18  ;;  %s21_s16 = int_to_ptr.vmem [resolvable:$true] %s20_s16 }
   0x5   :  { %p114_p1 = scmp.lt.u32.totalorder %s110_s18, %s286_s1 }
   0x7   :  { %p116_p2 = pnand %p114_p1, %p111_p0 }
   0x9   :  { %119 = shalt.err (!%p116_p2)
}
   0xa   :  { %s120_s23 = scalar_lea.vmem %s21_s16, 256  ;;  %p125_p4 = scmp.lt.s32.totalorder %s21_s16, %s21_s16 }
   0xb   :  { %p121_p3 = scmp.ne.s32.totalorder %s21_s16, %s120_s23  ;;  %p126_p5 = scmp.lt.s32.totalorder %s120_s23, %s120_s23 }
   0xd   :  { %p127_p6 = por %p126_p5, %p125_p4 }
   0xf   :  { %p128_p7 = pnand %p127_p6, %p121_p3 }
  0x11   :  { %131 = shalt.err (!%p128_p7)
}
  0x12   :  { %s207_s24 = smov 128   ;;  %s208_s25 = smov 8  }
  0x13   :  { %26 = dma.hbm_to_vmem [thread:$0]  %s286_s1, 256, %s21_s16, [#allocation7], %s207_s24, %s207_s24, %s208_s25  }
  0x14   :  { %s209_s28 = smov [#allocation9]   ;;  %s132_s6 = scalar_lea.hbm %s287_s2, 256 }
  0x15   :  { %s32_s29 = sshll.u32 %s209_s28, 4  ;;  %p133_p8 = scmp.ne.s32.totalorder %s287_s2, %s132_s6  ;;  %s33_s29 = int_to_ptr.vmem [resolvable:$true] %s32_s29 }
  0x16   :  { %p136_p9 = scmp.lt.u32.totalorder %s132_s6, %s287_s2 }
  0x18   :  { %p138_p10 = pnand %p136_p9, %p133_p8 }
  0x1a   :  { %141 = shalt.err (!%p138_p10)
}
  0x1b   :  { %s142_s11 = scalar_lea.vmem %s33_s29, 256  ;;  %p147_p12 = scmp.lt.s32.totalorder %s33_s29, %s33_s29 }
  0x1c   :  { %p143_p11 = scmp.ne.s32.totalorder %s33_s29, %s142_s11  ;;  %p148_p13 = scmp.lt.s32.totalorder %s142_s11, %s142_s11 }
  0x1e   :  { %p149_p0 = por %p148_p13, %p147_p12 }
  0x20   :  { %p150_p1 = pnand %p149_p0, %p143_p11 }
  0x22   :  { %153 = shalt.err (!%p150_p1)
}
  0x23   :  { %38 = dma.hbm_to_vmem [thread:$0]  %s287_s2, 256, %s33_s29, [#allocation10], %s207_s24, %s207_s24, %s208_s25  }
  0x24   :  { %198 = dma.done.wait [#allocation7], 256  }
  0x25   :  { %199 = vsyncadd [#allocation7], 4294967040 }
  0x26   :  { %200 = dma.done.wait [#allocation10], 256  }
  0x27   :  { %201 = vsyncadd [#allocation10], 4294967040  ;;  %v51_v0 = vld [vmem:[#allocation6] sm:$0xff]  ;;  %v52_v1 = vld [vmem:[#allocation6 + $0x8] sm:$0xff]  ;;  %s210_s13 = smov [#allocation11]   ;;  %s211_s15 = smov [#allocation12]  }
  0x28   :  { %v53_v2 = vld [vmem:[#allocation9] sm:$0xff]  ;;  %v54_v3 = vld [vmem:[#allocation9 + $0x8] sm:$0xff]  ;;  %s80_s14 = sshll.u32 %s210_s13, 4  ;;  %s90_s16 = sshll.u32 %s211_s15, 4  ;;  %s81_s14 = int_to_ptr.vmem [resolvable:$true] %s80_s14  ;;  %s91_s16 = int_to_ptr.vmem [resolvable:$true] %s90_s16 }
  0x29   :  { %v55_v4 = vmul.f32 %v53_v2, %v51_v0  ;;  %v57_v5 = vadd.f32 %v53_v2, %v51_v0  ;;  %v56_v6 = vmul.f32 %v54_v3, %v52_v1  ;;  %v58_v7 = vadd.f32 %v54_v3, %v52_v1  ;;  %s154_s2 = scalar_lea.vmem %s81_s14, 128  ;;  %p159_p3 = scmp.lt.s32.totalorder %s81_s14, %s81_s14 }
  0x2a   :  { %p155_p2 = scmp.ne.s32.totalorder %s81_s14, %s154_s2  ;;  %p160_p4 = scmp.lt.s32.totalorder %s154_s2, %s154_s2 }
  0x2b   :  { %v60_v8 = vadd.f32 %v56_v6, %v55_v4  ;;  %v64_v9 = vadd.f32 %v58_v7, %v57_v5 }
  0x2c   :  { %p161_p5 = por %p160_p4, %p159_p3 }
  0x2d   :  { %71 = vst [vmem:[#allocation11] sm:$0xff] %v60_v8  ;;  %73 = vst [vmem:[#allocation12] sm:$0xff] %v64_v9 }
  0x2e   :  { %p162_p6 = pnand %p161_p5, %p155_p2 }
  0x30   :  { %165 = shalt.err (!%p162_p6)
}
  0x31   :  { %s166_s18 = scalar_lea.hbm %s288_s3, 128 }
  0x32   :  { %p167_p7 = scmp.ne.s32.totalorder %s288_s3, %s166_s18  ;;  %p170_p8 = scmp.lt.u32.totalorder %s166_s18, %s288_s3 }
  0x34   :  { %p172_p9 = pnand %p170_p8, %p167_p7 }
  0x36   :  { %175 = shalt.err (!%p172_p9)
}
  0x37   :  { %83 = dma.vmem_to_hbm [thread:$0]  %s81_s14, 128, %s288_s3, [#allocation8]  }
  0x38   :  { %s176_s25 = scalar_lea.vmem %s91_s16, 128  ;;  %p181_p11 = scmp.lt.s32.totalorder %s91_s16, %s91_s16 }
  0x39   :  { %p177_p10 = scmp.ne.s32.totalorder %s91_s16, %s176_s25  ;;  %p182_p12 = scmp.lt.s32.totalorder %s176_s25, %s176_s25 }
  0x3b   :  { %p183_p13 = por %p182_p12, %p181_p11 }
  0x3d   :  { %p184_p0 = pnand %p183_p13, %p177_p10 }
  0x3f   :  { %187 = shalt.err (!%p184_p0)
}
  0x40   :  { %s188_s28 = scalar_lea.hbm %s289_s4, 128 }
  0x41   :  { %p189_p1 = scmp.ne.s32.totalorder %s289_s4, %s188_s28  ;;  %p192_p2 = scmp.lt.u32.totalorder %s188_s28, %s289_s4 }
  0x43   :  { %p194_p3 = pnand %p192_p2, %p189_p1 }
  0x45   :  { %197 = shalt.err (!%p194_p3)
}
  0x46   :  { %93 = dma.vmem_to_hbm [thread:$0]  %s91_s16, 128, %s289_s4, [#allocation13]  }
  0x47   :  { %202 = dma.done.wait [#allocation8], 128  }
  0x48   :  { %203 = vsyncadd [#allocation8], 4294967168 }
  0x49   :  { %204 = dma.done.wait [#allocation13], 128  }
  0x4a   :  { %205 = vsyncadd [#allocation13], 4294967168 }
  0x4b   :  { %100 = vsyncpa [#allocation7], 1 }
  0x4c   :  { %101 = vsyncpa [#allocation10], 1 }
  0x4d   :  { %102 = vsyncpa [#allocation8], 1 }
  0x4e   :  { %103 = vsyncpa [#allocation13], 1 }

</bundles_post_ra>
